<compile_context>
chip_gen: v6e
topology: v6e:2x2x1
jax: 0.10.0
libtpu: 0.0.40
codegen_flags: <defaults>
</compile_context>

<pallas_src>
import math

import jax
import jax.numpy as jnp
import numpy as np
from jax.experimental import pallas as pl
from jax.experimental.pallas import tpu as pltpu

_MIB = 1024 * 1024


def _round_up(x: int, m: int) -> int:
    return ((x + m - 1) // m) * m


def _vmem_capacity_bytes() -> int:
    try:
        return int(pltpu.get_tpu_info().vmem_capacity_bytes)
    except Exception:
        return 64 * _MIB  # conservative (v7x-sized) fallback


def _logits_lse_kernel(x_ref, w_ref, b_ref, logits_ref, lse_ref, m_scr, l_scr):
    # x_ref: (TM, D)  w_ref: (D, TV)  b_ref: (1, TV) f32
    # logits_ref: (TM, TV) f32 (raw logits cache, written once per tile)
    # lse_ref: (TM, 1) f32 (written at last vocab tile)
    # m_scr/l_scr: (TM, 1) f32 running max / running sum-of-exp.
    j = pl.program_id(1)

    @pl.when(j == 0)
    def _():
        m_scr[...] = jnp.full(m_scr.shape, -jnp.inf, m_scr.dtype)
        l_scr[...] = jnp.zeros(l_scr.shape, l_scr.dtype)

    # bf16 x bf16 -> f32 accumulation on the MXU; bias added in f32.
    logits = jnp.dot(x_ref[...], w_ref[...], preferred_element_type=jnp.float32)
    logits = logits + b_ref[...]
    logits_ref[...] = logits                      # cache raw logits (no recompute later)

    m_prev = m_scr[...]
    m_new = jnp.maximum(m_prev, jnp.max(logits, axis=-1, keepdims=True))
    l_scr[...] = l_scr[...] * jnp.exp(m_prev - m_new) + jnp.sum(
        jnp.exp(logits - m_new), axis=-1, keepdims=True)
    m_scr[...] = m_new

    @pl.when(j == pl.num_programs(1) - 1)
    def _():
        # lse computed once per M tile (hoisted out of the vocab loop).
        lse_ref[...] = m_scr[...] + jnp.log(l_scr[...])


def _normalize_kernel(logits_ref, lse_ref, o_ref):
    # log_softmax = logits - lse; in-place when o_ref aliases logits_ref's HBM.
    o_ref[...] = (logits_ref[...] - lse_ref[...]).astype(o_ref.dtype)


def projection_layer(x, weight, bias, *, tile_m=512, tile_v=512,
                     matmul_dtype=jnp.bfloat16, out_dtype=None):
    """x: (batch, seq, d_model); weight: (d_model, vocab); bias: (vocab,).

    Returns log_softmax(x @ weight + bias, axis=-1) with shape (batch, seq, vocab).
    Passing `weight` already in `matmul_dtype` skips the per-call cast.
    """
    batch, seq, d_model = x.shape
    d_model_w, vocab = weight.shape
    assert d_model_w == d_model, "weight must be (d_model, vocab)"
    out_dtype = x.dtype if out_dtype is None else out_dtype

    M = batch * seq
    sub = 16 if np.dtype(matmul_dtype).itemsize < 4 else 8  # sublane packing of x

    vmem_cap = _vmem_capacity_bytes()
    vmem_limit = max(32 * _MIB, min(100 * _MIB, vmem_cap - 8 * _MIB))
    if vmem_cap <= 64 * _MIB:
        # v7x: 64 MiB VMEM and ~3.2 TB/s HBM -> smaller M tiles are fine.
        tile_m = min(tile_m, 256)

    # M tiling: minimize padding and guarantee >= 2 M tiles when possible so
    # both v7x TensorCores get work (i-axis is marked "parallel").
    n_m = max(1, -(-M // tile_m))
    if n_m == 1 and M > sub:
        n_m = 2
    tm = _round_up(-(-M // n_m), sub)
    Mp = tm * n_m

    tv = min(tile_v, _round_up(vocab, 128))   # lane-dense output tiles
    Vp = _round_up(vocab, tv)
    n_v = Vp // tv

    # Cast matmul operands only if needed (hoist the weight cast to init time).
    x2d = x.reshape(M, d_model)
    if x2d.dtype != np.dtype(matmul_dtype):
        x2d = x2d.astype(matmul_dtype)
    w = weight if weight.dtype == np.dtype(matmul_dtype) else weight.astype(matmul_dtype)
    b = bias.astype(jnp.float32)

    if Mp != M:
        x2d = jnp.pad(x2d, ((0, Mp - M), (0, 0)))
    if Vp != vocab:
        w = jnp.pad(w, ((0, 0), (0, Vp - vocab)))
        # Very negative bias on padded lanes -> exp underflows to 0; a vocab
        # tile can never be entirely padding (Vp - vocab < tv).
        b = jnp.pad(b, ((0, Vp - vocab),), constant_values=-1e30)
    b2d = b.reshape(1, Vp)

    w_item = np.dtype(matmul_dtype).itemsize
    cost1 = pl.CostEstimate(
        flops=int(2 * Mp * d_model * Vp),
        transcendentals=int(Mp * Vp),
        bytes_accessed=int(Mp * d_model * w_item + n_m * d_model * Vp * w_item
                           + n_m * Vp * 4 + Mp * Vp * 4 + Mp * 4),
    )

    # ---- Pass 1: logits (cached to HBM) + per-row logsumexp, single matmul ----
    logits, lse = pl.pallas_call(
        _logits_lse_kernel,
        out_shape=(jax.ShapeDtypeStruct((Mp, Vp), jnp.float32),
                   jax.ShapeDtypeStruct((Mp, 1), jnp.float32)),
        grid_spec=pltpu.PrefetchScalarGridSpec(
            num_scalar_prefetch=0,
            grid=(n_m, n_v),
            in_specs=[
                # x tile only changes with i -> DMA'd once per M tile.
                pl.BlockSpec((tm, d_model), lambda i, j: (i, 0)),
                # weight / bias panels stream along the vocab axis.
                pl.BlockSpec((d_model, tv), lambda i, j: (0, j)),
                pl.BlockSpec((1, tv), lambda i, j: (0, j)),
            ],
            out_specs=[
                pl.BlockSpec((tm, tv), lambda i, j: (i, j)),   # raw logits
                pl.BlockSpec((tm, 1), lambda i, j: (i, 0)),    # lse (resident over j)
            ],
            scratch_shapes=[pltpu.VMEM((tm, 1), jnp.float32),   # running max
                            pltpu.VMEM((tm, 1), jnp.float32)],  # running sum of exp
        ),
        compiler_params=pltpu.CompilerParams(
            dimension_semantics=("parallel", "arbitrary"),
            vmem_limit_bytes=vmem_limit),
        cost_estimate=cost1,
    )(x2d, w, b2d)

    # ---- Pass 2: out = logits - lse (mem-bound, in place when dtypes match) ----
    out_item = np.dtype(out_dtype).itemsize
    cost2 = pl.CostEstimate(
        flops=int(Mp * Vp),
        transcendentals=0,
        bytes_accessed=int(Mp * Vp * 4 + Mp * 4 + Mp * Vp * out_item),
    )
    aliases = {0: 0} if np.dtype(out_dtype) == np.dtype(jnp.float32) else {}

    out2d = pl.pallas_call(
        _normalize_kernel,
        out_shape=jax.ShapeDtypeStruct((Mp, Vp), out_dtype),
        grid_spec=pltpu.PrefetchScalarGridSpec(
            num_scalar_prefetch=0,
            grid=(n_m, n_v),
            in_specs=[
                pl.BlockSpec((tm, tv), lambda i, j: (i, j)),
                pl.BlockSpec((tm, 1), lambda i, j: (i, 0)),
            ],
            out_specs=pl.BlockSpec((tm, tv), lambda i, j: (i, j)),
        ),
        compiler_params=pltpu.CompilerParams(
            dimension_semantics=("parallel", "parallel"),
            vmem_limit_bytes=vmem_limit),
        cost_estimate=cost2,
        input_output_aliases=aliases,
    )(logits, lse)

    out2d = out2d[:M, :vocab]
    return out2d.reshape(batch, seq, vocab)


if __name__ == "__main__":
    # Small shapes exercising M-padding (M=18 -> two 16-row tiles for megacore),
    # multiple vocab tiles, and vocab padding.
    batch, seq, d_model, vocab = 2, 9, 32, 300

    key = jax.random.PRNGKey(0)
    kx, kw, kb = jax.random.split(key, 3)

    # Deterministic nn.Linear-style init: U(-1/sqrt(d_model), 1/sqrt(d_model)).
    bound = 1.0 / math.sqrt(d_model)
    weight = jax.random.uniform(kw, (d_model, vocab), jnp.float32, -bound, bound)
    bias = jax.random.uniform(kb, (vocab,), jnp.float32, -bound, bound)
    x = jax.random.normal(kx, (batch, seq, d_model), jnp.float32)

    # Hoist the bf16 weight cast out of the per-call hot path (once, at "init").
    weight_bf16 = weight.astype(jnp.bfloat16)

    # Small explicit tiles so the test covers multiple vocab tiles; production
    # callers use the defaults (tile_m=512, tile_v=512).
    proj = jax.jit(lambda xx, ww, bb: projection_layer(xx, ww, bb,
                                                       tile_m=128, tile_v=128))
    out = proj(x, weight_bf16, bias)
    jax.block_until_ready(out)

    # Reference: same bf16-input / f32-accumulation matmul, plain log_softmax.
    logits_ref = jnp.einsum(
        "bsd,dv->bsv", x.astype(jnp.bfloat16), weight_bf16,
        preferred_element_type=jnp.float32) + bias
    ref = jax.nn.log_softmax(logits_ref, axis=-1)

    assert out.shape == (batch, seq, vocab)
    err = float(jnp.max(jnp.abs(out - ref)))
    assert jnp.allclose(out, ref, atol=1e-4, rtol=1e-4), f"max abs err = {err}"

    # bf16 output path (halves output-stream HBM traffic); precision lost only
    # at the final store, so tolerance is bf16-level.
    proj_bf16 = jax.jit(lambda xx, ww, bb: projection_layer(
        xx, ww, bb, tile_m=128, tile_v=128, out_dtype=jnp.bfloat16))
    out_bf16 = proj_bf16(x, weight_bf16, bias)
    jax.block_until_ready(out_bf16)
    assert out_bf16.dtype == jnp.bfloat16 and out_bf16.shape == (batch, seq, vocab)
    err_bf16 = float(jnp.max(jnp.abs(out_bf16.astype(jnp.float32) - ref)))
    assert err_bf16 < 0.1, f"bf16 max abs err = {err_bf16}"

    print("KERNEL_OK")
</pallas_src>

<mosaic_0001>
module attributes {stable_mosaic.version = 11 : i64} {
  func.func @_logits_lse_kernel(%arg0: i32, %arg1: i32, %arg2: memref<16x32xbf16, #tpu.memory_space<vmem>>, %arg3: memref<32x128xbf16, #tpu.memory_space<vmem>>, %arg4: memref<1x128xf32, #tpu.memory_space<vmem>>, %arg5: memref<16x128xf32, #tpu.memory_space<vmem>>, %arg6: memref<16x1xf32, #tpu.memory_space<vmem>>, %arg7: memref<16x1xf32, #tpu.memory_space<vmem>>, %arg8: memref<16x1xf32, #tpu.memory_space<vmem>>) attributes {dimension_semantics = [#tpu.dimension_semantics<parallel>, #tpu.dimension_semantics<arbitrary>], iteration_bounds = array<i64: 2, 3>, scalar_prefetch = 0 : i64, scratch_operands = 2 : i64, tpu.core_type = #tpu.core_type<tc>, window_params = [{transform_indices = @transform_0, window_bounds = array<i64: 16, 32>}, {transform_indices = @transform_1, window_bounds = array<i64: 32, 128>}, {transform_indices = @transform_2, window_bounds = array<i64: 1, 128>}, {transform_indices = @transform_3, window_bounds = array<i64: 16, 128>}, {transform_indices = @transform_4, window_bounds = array<i64: 16, 1>}]} {
    %c0_i32 = arith.constant 0 : i32
    %0 = arith.cmpi eq, %arg1, %c0_i32 : i32
    %1 = arith.extui %0 : i1 to i32
    %c0_i32_0 = arith.constant 0 : i32
    %2 = arith.cmpi ne, %1, %c0_i32_0 : i32
    scf.if %2 {
      %cst_19 = arith.constant 0xFF800000 : f32
      %29 = vector.broadcast %cst_19 : f32 to vector<16x1xf32>
      %c0_20 = arith.constant 0 : index
      %c0_21 = arith.constant 0 : index
      %30 = vector.load %arg7[%c0_20, %c0_21] : memref<16x1xf32, #tpu.memory_space<vmem>>, vector<16x1xf32>
      tpu.vector_store %arg7[%c0_20, %c0_21], %29 {strides = array<i32>} : memref<16x1xf32, #tpu.memory_space<vmem>>, vector<16x1xf32>,
      %cst_22 = arith.constant 0.000000e+00 : f32
      %31 = vector.broadcast %cst_22 : f32 to vector<16x1xf32>
      %c0_23 = arith.constant 0 : index
      %c0_24 = arith.constant 0 : index
      %32 = vector.load %arg8[%c0_23, %c0_24] : memref<16x1xf32, #tpu.memory_space<vmem>>, vector<16x1xf32>
      tpu.vector_store %arg8[%c0_23, %c0_24], %31 {strides = array<i32>} : memref<16x1xf32, #tpu.memory_space<vmem>>, vector<16x1xf32>,
    } else {
    }
    %c0 = arith.constant 0 : index
    %c0_1 = arith.constant 0 : index
    %3 = vector.load %arg2[%c0, %c0_1] : memref<16x32xbf16, #tpu.memory_space<vmem>>, vector<16x32xbf16>
    %c0_2 = arith.constant 0 : index
    %c0_3 = arith.constant 0 : index
    %4 = vector.load %arg3[%c0_2, %c0_3] : memref<32x128xbf16, #tpu.memory_space<vmem>>, vector<32x128xbf16>
    %cst = arith.constant dense<0.000000e+00> : vector<16x128xf32>
    %5 = tpu.matmul %3, %4, %cst {dimension_numbers = #tpu.dot_dimension_numbers<[1], [0], [0], [1], [0, 0, 1, 1], [], []>} : vector<16x32xbf16>, vector<32x128xbf16>, vector<16x128xf32> -> vector<16x128xf32>
    %c0_4 = arith.constant 0 : index
    %c0_5 = arith.constant 0 : index
    %6 = vector.load %arg4[%c0_4, %c0_5] : memref<1x128xf32, #tpu.memory_space<vmem>>, vector<1x128xf32>
    %7 = vector.broadcast %6 : vector<1x128xf32> to vector<16x128xf32>
    %8 = arith.addf %5, %7 : vector<16x128xf32>
    %c0_6 = arith.constant 0 : index
    %c0_7 = arith.constant 0 : index
    %9 = vector.load %arg5[%c0_6, %c0_7] : memref<16x128xf32, #tpu.memory_space<vmem>>, vector<16x128xf32>
    tpu.vector_store %arg5[%c0_6, %c0_7], %8 {strides = array<i32>} : memref<16x128xf32, #tpu.memory_space<vmem>>, vector<16x128xf32>,
    %c0_8 = arith.constant 0 : index
    %c0_9 = arith.constant 0 : index
    %10 = vector.load %arg7[%c0_8, %c0_9] : memref<16x1xf32, #tpu.memory_space<vmem>>, vector<16x1xf32>
    %cst_10 = arith.constant dense<0xFF800000> : vector<16xf32>
    %11 = vector.multi_reduction <maximumf>, %8, %cst_10 [1] : vector<16x128xf32> to vector<16xf32>
    %12 = vector.shape_cast %11 : vector<16xf32> to vector<16x1xf32>
    %13 = arith.maximumf %10, %12 : vector<16x1xf32>
    %c0_11 = arith.constant 0 : index
    %c0_12 = arith.constant 0 : index
    %14 = vector.load %arg8[%c0_11, %c0_12] : memref<16x1xf32, #tpu.memory_space<vmem>>, vector<16x1xf32>
    %15 = arith.subf %10, %13 : vector<16x1xf32>
    %16 = math.exp %15 : vector<16x1xf32>
    %17 = arith.mulf %14, %16 : vector<16x1xf32>
    %18 = vector.broadcast %13 : vector<16x1xf32> to vector<16x128xf32>
    %19 = arith.subf %8, %18 : vector<16x128xf32>
    %20 = math.exp %19 : vector<16x128xf32>
    %cst_13 = arith.constant dense<0.000000e+00> : vector<16xf32>
    %21 = vector.multi_reduction <add>, %20, %cst_13 [1] : vector<16x128xf32> to vector<16xf32>
    %22 = vector.shape_cast %21 : vector<16xf32> to vector<16x1xf32>
    %23 = arith.addf %17, %22 : vector<16x1xf32>
    %c0_14 = arith.constant 0 : index
    %c0_15 = arith.constant 0 : index
    %24 = vector.load %arg8[%c0_14, %c0_15] : memref<16x1xf32, #tpu.memory_space<vmem>>, vector<16x1xf32>
    tpu.vector_store %arg8[%c0_14, %c0_15], %23 {strides = array<i32>} : memref<16x1xf32, #tpu.memory_space<vmem>>, vector<16x1xf32>,
    %c0_16 = arith.constant 0 : index
    %c0_17 = arith.constant 0 : index
    %25 = vector.load %arg7[%c0_16, %c0_17] : memref<16x1xf32, #tpu.memory_space<vmem>>, vector<16x1xf32>
    tpu.vector_store %arg7[%c0_16, %c0_17], %13 {strides = array<i32>} : memref<16x1xf32, #tpu.memory_space<vmem>>, vector<16x1xf32>,
    %c2_i32 = arith.constant 2 : i32
    %26 = arith.cmpi eq, %arg1, %c2_i32 : i32
    %27 = arith.extui %26 : i1 to i32
    %c0_i32_18 = arith.constant 0 : i32
    %28 = arith.cmpi ne, %27, %c0_i32_18 : i32
    scf.if %28 {
      %c0_19 = arith.constant 0 : index
      %c0_20 = arith.constant 0 : index
      %29 = vector.load %arg7[%c0_19, %c0_20] : memref<16x1xf32, #tpu.memory_space<vmem>>, vector<16x1xf32>
      %c0_21 = arith.constant 0 : index
      %c0_22 = arith.constant 0 : index
      %30 = vector.load %arg8[%c0_21, %c0_22] : memref<16x1xf32, #tpu.memory_space<vmem>>, vector<16x1xf32>
      %31 = math.log %30 : vector<16x1xf32>
      %32 = arith.addf %29, %31 : vector<16x1xf32>
      %c0_23 = arith.constant 0 : index
      %c0_24 = arith.constant 0 : index
      %33 = vector.load %arg6[%c0_23, %c0_24] : memref<16x1xf32, #tpu.memory_space<vmem>>, vector<16x1xf32>
      tpu.vector_store %arg6[%c0_23, %c0_24], %32 {strides = array<i32>} : memref<16x1xf32, #tpu.memory_space<vmem>>, vector<16x1xf32>,
    } else {
    }
    return
  }
  func.func @transform_0(%arg0: i32, %arg1: i32) -> (i32, i32) {
    %c0_i32 = arith.constant 0 : i32
    %c0_i32_0 = arith.constant 0 : i32
    return %arg0, %c0_i32 : i32, i32
  }
  func.func @transform_1(%arg0: i32, %arg1: i32) -> (i32, i32) {
    %c0_i32 = arith.constant 0 : i32
    %c0_i32_0 = arith.constant 0 : i32
    return %c0_i32, %arg1 : i32, i32
  }
  func.func @transform_2(%arg0: i32, %arg1: i32) -> (i32, i32) {
    %c0_i32 = arith.constant 0 : i32
    %c0_i32_0 = arith.constant 0 : i32
    return %c0_i32, %arg1 : i32, i32
  }
  func.func @transform_3(%arg0: i32, %arg1: i32) -> (i32, i32) {
    %c0_i32 = arith.constant 0 : i32
    return %arg0, %arg1 : i32, i32
  }
  func.func @transform_4(%arg0: i32, %arg1: i32) -> (i32, i32) {
    %c0_i32 = arith.constant 0 : i32
    %c0_i32_0 = arith.constant 0 : i32
    return %arg0, %c0_i32 : i32, i32
  }
}

module attributes {stable_mosaic.version = 11 : i64} {
  func.func @_normalize_kernel(%arg0: i32, %arg1: i32, %arg2: memref<16x128xf32, #tpu.memory_space<vmem>>, %arg3: memref<16x1xf32, #tpu.memory_space<vmem>>, %arg4: memref<16x128xf32, #tpu.memory_space<vmem>>) attributes {dimension_semantics = [#tpu.dimension_semantics<parallel>, #tpu.dimension_semantics<parallel>], iteration_bounds = array<i64: 2, 3>, scalar_prefetch = 0 : i64, scratch_operands = 0 : i64, tpu.core_type = #tpu.core_type<tc>, window_params = [{transform_indices = @transform_0, window_bounds = array<i64: 16, 128>}, {transform_indices = @transform_1, window_bounds = array<i64: 16, 1>}, {transform_indices = @transform_2, window_bounds = array<i64: 16, 128>}]} {
    %c0 = arith.constant 0 : index
    %c0_0 = arith.constant 0 : index
    %0 = vector.load %arg2[%c0, %c0_0] : memref<16x128xf32, #tpu.memory_space<vmem>>, vector<16x128xf32>
    %c0_1 = arith.constant 0 : index
    %c0_2 = arith.constant 0 : index
    %1 = vector.load %arg3[%c0_1, %c0_2] : memref<16x1xf32, #tpu.memory_space<vmem>>, vector<16x1xf32>
    %2 = vector.broadcast %1 : vector<16x1xf32> to vector<16x128xf32>
    %3 = arith.subf %0, %2 : vector<16x128xf32>
    %c0_3 = arith.constant 0 : index
    %c0_4 = arith.constant 0 : index
    %4 = vector.load %arg4[%c0_3, %c0_4] : memref<16x128xf32, #tpu.memory_space<vmem>>, vector<16x128xf32>
    tpu.vector_store %arg4[%c0_3, %c0_4], %3 {strides = array<i32>} : memref<16x128xf32, #tpu.memory_space<vmem>>, vector<16x128xf32>,
    return
  }
  func.func @transform_0(%arg0: i32, %arg1: i32) -> (i32, i32) {
    %c0_i32 = arith.constant 0 : i32
    return %arg0, %arg1 : i32, i32
  }
  func.func @transform_1(%arg0: i32, %arg1: i32) -> (i32, i32) {
    %c0_i32 = arith.constant 0 : i32
    %c0_i32_0 = arith.constant 0 : i32
    return %arg0, %c0_i32 : i32, i32
  }
  func.func @transform_2(%arg0: i32, %arg1: i32) -> (i32, i32) {
    %c0_i32 = arith.constant 0 : i32
    return %arg0, %arg1 : i32, i32
  }
}

</mosaic_0001>

<bundles_post_ra>
// kernel: _lambda_.3
= control target key start
LH: loop header
LB: loop body
LE: loop exit
PB: predicated region body
PF: predicated region fallthrough
CT: control target
= control target key end

     0   :  { %s522_s9 = smov 0   ;;  %s524_s10 = smov 0   ;;  %s622_s0 = inlined_call_operand.vmem [shape: f32[32,384], index: 0, kind: input, shape index: {}, may-alias: {0,2}]   ;;  %s623_s1 = inlined_call_operand.vmem [shape: f32[32,1], index: 1, kind: input, shape index: {}]   ;;  %s624_s2 = inlined_call_operand.vmem [shape: f32[32,384], index: 2, kind: output, shape index: {}, may-alias: {0,2}]  }
   0x1   :  { %s526_s11 = smov 0   ;;  %s528_s12 = smov 0  }
   0x2   :  { %s530_s13 = smov 0   ;;  %s532_s14 = smov 0  }
   0x3   :  { %s534_s15 = smov 0  }
   0x4 LB: > { %s21_s16 = sadd.s32 1, %s496_s13  ;;  %s24_s17 = sadd.s32 1, %s500_s14  ;;  %s504_s15 = sphi %s534_s15, %s12_s15   ;;  %s500_s14 = sphi %s532_s14, %s631_s14   ;;  %s496_s13 = sphi %s530_s13, %s630_s13   ;;  %s492_s12 = sphi %s528_s12, %s629_s12   ;;  %s488_s11 = sphi %s526_s11, %s628_s11   ;;  %s484_s10 = sphi %s524_s10, %s627_s10   ;;  %s480_s9 = sphi %s522_s9, %s626_s9  }
   0x5   : > { %p22_p0 = scmp.ge.s32.totalorder %s21_s16, 3  ;;  %s371_s18 = sadd.s32 4294967295, %s504_s15  }
   0x6   : > { %p40_p1 = scmp.ne.s32.totalorder %s484_s10, %s480_s9  ;;  %p41_p2 = scmp.eq.s32.totalorder %s504_s15, 0 }
   0x7   : > { %s633_s16 = smov (%p22_p0, %s21_s16), 0  ;;  %s635_s17 = smov (!%p22_p0, %s24_s17), %s500_s14 }
   0x8   : > { %p26_p3 = scmp.ge.s32.totalorder %s635_s17, 2  ;;  %p98_p4 = scmp.eq.s32.totalorder %s371_s18, 5 }
   0x9   : > { %s29_s19 = ssub.s32 %s496_s13, %s633_s16  ;;  %p42_p5 = por %p41_p2, %p40_p1 }
   0xa   : > { %s637_s17 = smov (%p26_p3, %s635_s17), 0  ;;  %p570_p6 = por %p98_p4, %p40_p1 }
   0xb   : > { %s28_s21 = ssub.s32 %s500_s14, %s637_s17  ;;  %s33_s23 = sadd.s32 1, %s484_s10 }
   0xc   : > { %s30_s22 = sor.u32 %s29_s19, %s28_s21  ;;  %p374_p8 = scmp.ge.s32.totalorder %s504_s15, 6 }
   0xd   : > { %p31_p7 = scmp.eq.s32.totalorder %s30_s22, 0 }
   0xe   : > { %120 = sbr.rel (%p374_p8) target bundleno = 27 (0x1b), region = 16 }
   0xf   : > { %s578_s24 = scalar_select %p31_p7, %s484_s10, %s33_s23  }
  0x13   : > { %123 = sbr.rel (!%p42_p5) target bundleno = 27 (0x1b), region = 20  ;;  %s125_s25 = sand.u32 (%p42_p5), 1, %s484_s10  }
  0x14   : > { %s390_s26 = smul.u32 (%p42_p5), 6, %s500_s14  ;;  %s375_s27 = sshll.u32 (%p42_p5), %s125_s25, 4 }
  0x15   : > { %s127_s5 = scalar_lea.vmem (%p42_p5), [#allocation2], %s375_s27 }
  0x16   : > { %s130_s28 = sadd.s32 (%p42_p5), %s496_s13, %s390_s26 }
  0x17   : > { %s378_s29 = sshll.u32 (%p42_p5), %s130_s28, 3 }
  0x18   : > { %s132_s4 = scalar_lea.vmem %s622_s0, %s378_s29 }
  0x19   : > { %v163_v0 = vld [vmem:[%s132_s4] sm:$0xff]  ;;  %v165_v1 = vld [vmem:[%s132_s4 + $0x18] sm:$0xff] }
  0x1a   : > { %164 = vst [vmem:[%s127_s5] sm:$0xff] %v163_v0  ;;  %166 = vst [vmem:[%s127_s5 + $0x8] sm:$0xff] %v165_v1 }
  0x1b PF: > { %p379_p9 = scmp.ge.s32.totalorder %s504_s15, 1  ;;  %p180_p10 = scmp.lt.s32.totalorder %s504_s15, 7 }
  0x1d   : > { %p181_p11 = pnand %p379_p9, %p180_p10 }
  0x1e   : > { %s382_s6 = sshll.u32 (!%p181_p11), %s492_s12, 1  ;;  %s187_s21 = sand.u32 (!%p181_p11), 1, %s480_s9  }
  0x1f   : > { %184 = sbr.rel (%p181_p11) target bundleno = 179 (0xb3), region = 62  ;;  %p214_p12 = scmp.lt.s32.totalorder (!%p181_p11), %s382_s6, 3 }
  0x20   : > { %s380_s22 = sshll.u32 (!%p181_p11), %s187_s21, 4 }
  0x21   : > { %s189_s23 = scalar_lea.vmem (!%p181_p11), [#allocation2], %s380_s22  ;;  %s211_s25 = scalar_lea.vmem (!%p181_p11), [#allocation3], %s380_s22 }
  0x24   : > { %v506_v2 = vmov 0   ;;  %s639_s6 = smov (!%p214_p12, %s382_s6), 3  ;;  %v220_v5 = vld [vmem:[%s189_s23] sm:$0xff]  ;;  %v221_v8 = vld [vmem:[%s189_s23 + $0x8] sm:$0xff]  ;;  %s391_s26 = smul.u32 (%p570_p6), 6, %s492_s12 }
  0x25   : > { %449 = vset.pattern.permute.xlu0 %v506_v2  ;;  %s383_s7 = sshll.u32 %s639_s6, 3 }
  0x26   : > { %s217_s19 = scalar_lea.vmem %s623_s1, %s383_s7  ;;  %s247_s27 = sadd.s32 (%p570_p6), %s488_s11, %s391_s26 }
  0x27   : > { %v222_v3 = vld [vmem:[%s217_s19] sm:$0xff]  ;;  %v223_v4 = vld [vmem:[%s217_s19 + $0x8] sm:$0xff]  ;;  %s387_s9 = sshll.u32 (%p570_p6), %s247_s27, 3 }
  0x28   : > { %226 = vperm.xlu0 %449, %v222_v3   ;;  %s249_s30 = scalar_lea.vmem (%p570_p6), %s624_s2, %s387_s9 }
  0x2c   : > { %231 = vperm.xlu0 %449, %v223_v4  }
  0xa3   : > { %v227_v6 = vpop.permute.xlu0 %226 }
  0xa4   : > { %v234_v7 = vsub.f32 %v220_v5, %v227_v6 }
  0xa6   : > { %236 = vst [vmem:[%s211_s25] sm:$0xff] %v234_v7  ;;  %244 = sbr.rel (!%p570_p6) target bundleno = 179 (0xb3), region = 70 }
  0xa7   : > { %v232_v9 = vpop.permute.xlu0 %231 }
  0xa8   : > { %v235_v10 = vsub.f32 %v221_v8, %v232_v9 }
  0xaa   : > { %237 = vst [vmem:[%s211_s25 + $0x8] sm:$0xff] %v235_v10 }
  0xad   : > { %v280_v11 = vld [vmem:[%s211_s25] sm:$0xff] }
  0xae   : > { %281 = vst [vmem:[%s249_s30] sm:$0xff] %v280_v11 }
  0xb1   : > { %v282_v12 = vld [vmem:[%s211_s25 + $0x8] sm:$0xff] }
  0xb2   : > { %283 = vst [vmem:[%s249_s30 + $0x18] sm:$0xff] %v282_v12 }
  0xb3 PF: > { %s12_s15 = sadd.s32 1, %s504_s15   ;;  %s626_s9 = smov %s484_s10 }
  0xb4   : > { %p9_p13 = scmp.ge.s32.totalorder %s12_s15, 8   ;;  %s627_s10 = smov %s578_s24 }
  0xb5   : > { %s628_s11 = smov %s496_s13  ;;  %s629_s12 = smov %s500_s14 }
  0xb6   : > { %s630_s13 = smov %s633_s16  ;;  %s631_s14 = smov %s637_s17 }
  0xb7   :  { %11 = sbr.rel (!%p9_p13) target bundleno = 4 (0x4), region = 142 }

// kernel: _lambda_.2
= control target key start
LH: loop header
LB: loop body
LE: loop exit
PB: predicated region body
PF: predicated region fallthrough
CT: control target
= control target key end

     0   :  { %s1019_s0 = inlined_call_operand.vmem [shape: bf16[32,32], index: 0, kind: input, shape index: {}]   ;;  %s1020_s1 = inlined_call_operand.vmem [shape: bf16[32,384], index: 1, kind: input, shape index: {}]   ;;  %s1021_s2 = inlined_call_operand.vmem [shape: f32[1,384], index: 2, kind: input, shape index: {}]   ;;  %s1022_s3 = inlined_call_operand.vmem [shape: f32[32,384], index: 3, kind: output, shape index: {0}]   ;;  %s1023_s4 = inlined_call_operand.vmem [shape: f32[32,1], index: 4, kind: output, shape index: {1}]  }
   0x1   :  { %1026 = sst [smem:[#allocation8_spill]] %s1020_s1 }
   0x2   :  { %s868_s15 = smov 0   ;;  %s870_s16 = smov 0  }
   0x3   :  { %s872_s17 = smov 0   ;;  %s874_s18 = smov 0  }
   0x4   :  { %s876_s19 = smov 0   ;;  %s878_s20 = smov 0  }
   0x5   :  { %s880_s21 = smov 0   ;;  %s882_s22 = smov 0  }
   0x6   :  { %s884_s23 = smov 0  }
   0x7 LB: > { %s634_s24 = sadd.s32 4294967295, %s836_s23   ;;  %s24_s25 = sadd.s32 1, %s828_s21  ;;  %s836_s23 = sphi %s884_s23, %s15_s23   ;;  %s832_s22 = sphi %s882_s22, %s1040_s22   ;;  %s828_s21 = sphi %s880_s21, %s1039_s21   ;;  %s824_s20 = sphi %s878_s20, %s1038_s20   ;;  %s820_s19 = sphi %s876_s19, %s1037_s19   ;;  %s816_s18 = sphi %s874_s18, %s1036_s18   ;;  %s812_s17 = sphi %s872_s17, %s1035_s17   ;;  %s808_s16 = sphi %s870_s16, %s1034_s16   ;;  %s804_s15 = sphi %s868_s15, %s1033_s15  }
   0x8   : > { %p25_p0 = scmp.ge.s32.totalorder %s24_s25, 3  ;;  %s27_s26 = sadd.s32 1, %s832_s22 }
   0x9   : > { %s60_s27 = sadd.s32 1, %s816_s18  ;;  %p67_p1 = scmp.ne.s32.totalorder %s816_s18, %s812_s17 }
   0xa   : > { %s1042_s25 = smov (%p25_p0, %s24_s25), 0  ;;  %s1044_s26 = smov (!%p25_p0, %s27_s26), %s832_s22 }
   0xb   : > { %1027 = sst [smem:[#allocation6_spill]] %s1042_s25  ;;  %s57_s28 = ssub.s32 %s828_s21, %s1042_s25 }
   0xc   : > { %p68_p2 = scmp.eq.s32.totalorder %s836_s23, 0  ;;  %p29_p3 = scmp.ge.s32.totalorder %s1044_s26, 2 }
   0xd   : > { %p58_p4 = scmp.eq.s32.totalorder %s57_s28, 0  ;;  %s114_s29 = sadd.s32 1, %s808_s16 }
   0xe   : > { %p69_p5 = por %p68_p2, %p67_p1  ;;  %s1046_s26 = smov (%p29_p3, %s1044_s26), 0 }
   0xf   : > { %1028 = sst [smem:[#allocation7_spill]] %s1046_s26  ;;  %s109_s5 = ssub.s32 %s832_s22, %s1046_s26 }
  0x10   : > { %s929_s30 = scalar_select %p58_p4, %s816_s18, %s60_s27  }
  0x11   : > { %p124_p6 = scmp.ne.s32.totalorder %s808_s16, %s804_s15  ;;  %s111_s6 = sor.u32 %s109_s5, %s57_s28 }
  0x12   : > { %p125_p7 = scmp.eq.s32.totalorder %s634_s24, 5  ;;  %p112_p8 = scmp.eq.s32.totalorder %s111_s6, 0 }
  0x13   : > { %p637_p10 = scmp.ge.s32.totalorder %s836_s23, 6 }
  0x14   : > { %p935_p9 = por %p125_p7, %p124_p6 }
  0x15   : > { %s940_s8 = scalar_select %p112_p8, %s808_s16, %s114_s29  }
  0x16   : > { %173 = sbr.rel (%p637_p10) target bundleno = 39 (0x27), region = 16 }
  0x1b   : > { %185 = sbr.rel (!%p69_p5) target bundleno = 39 (0x27), region = 24  ;;  %s187_s9 = sand.u32 (%p69_p5), 1, %s816_s18  }
  0x1c   : > { %s639_s10 = sshll.u32 (%p69_p5), %s828_s21, 2  ;;  %s638_s11 = sshll.u32 (%p69_p5), %s187_s9, 4 }
  0x1d   : > { %s1030_s1 = sld [smem:[#allocation8_spill]] (%p69_p5)  ;;  %s189_s24 = scalar_lea.vmem (%p69_p5), [#allocation4], %s638_s11 }
  0x23   : > { %s191_s14 = scalar_lea.vmem %s1030_s1, %s639_s10 }
  0x24   : > { %v208_v0 = vld [vmem:[%s191_s14] sm:$0xf]  ;;  %v210_v1 = vld [vmem:[%s191_s14 + $0xc] sm:$0xf]  ;;  %v212_v2 = vld [vmem:[%s191_s14 + $0x18] sm:$0xf] }
  0x25   : > { %209 = vst [vmem:[%s189_s24] sm:$0xf] %v208_v0  ;;  %211 = vst [vmem:[%s189_s24 + $0x4] sm:$0xf] %v210_v1  ;;  %v214_v3 = vld [vmem:[%s191_s14 + $0x24] sm:$0xf] }
  0x26   : > { %213 = vst [vmem:[%s189_s24 + $0x8] sm:$0xf] %v212_v2  ;;  %215 = vst [vmem:[%s189_s24 + $0xc] sm:$0xf] %v214_v3 }
  0x27 PF: > { %p640_p11 = scmp.ge.s32.totalorder %s836_s23, 1  ;;  %p252_p12 = scmp.lt.s32.totalorder %s836_s23, 7 }
  0x29   : > { %p253_p13 = pnand %p640_p11, %p252_p12 }
  0x2a   : > { %s259_s27 = sand.u32 (!%p253_p13), 1, %s812_s17   ;;  %s286_s28 = sand.u32 (!%p253_p13), 1, %s804_s15  }
  0x2b   : > { %256 = sbr.rel (%p253_p13) target bundleno = 721 (0x2d1), region = 69  ;;  %s641_s29 = sshll.u32 (!%p253_p13), %s259_s27, 4 }
  0x2c   : > { %s642_s5 = sshll.u32 (!%p253_p13), %s286_s28, 4  ;;  %s643_s6 = sshll.u32 (!%p253_p13), %s824_s20, 1 }
  0x2d   : > { %p302_p0 = scmp.lt.s32.totalorder (!%p253_p13), %s820_s19, 2  ;;  %p297_p1 = scmp.lt.s32.totalorder (!%p253_p13), %s643_s6, 3 }
  0x2e   : > { %s261_s26 = scalar_lea.vmem (!%p253_p13), [#allocation4], %s641_s29  ;;  %s969_s25 = scalar_lea.vmem (!%p253_p13), [#allocation5], %s642_s5 }
  0x2f   : > { %p647_p2 = scmp.ne.s32.totalorder (!%p253_p13), %s820_s19, 0 }
  0x30   : > { %s955_s9 = scalar_select %p302_p0, %s820_s19, 2 }
  0x31   : > { %s1048_s6 = smov (!%p297_p1, %s643_s6), 3  ;;  %316 = sbr.rel (%p647_p2) target bundleno = 57 (0x39), region = 77 }
  0x32   : > { %s304_s12 = scalar_lea.vmem %s1021_s2, %s955_s9  ;;  %s644_s13 = sshll.u32 %s1048_s6, 2 }
  0x33   : > { %s646_s14 = sshll.u32 %s1048_s6, 3  ;;  %s300_s17 = scalar_lea.vmem %s1019_s0, %s644_s13 }
  0x34   : > { %s967_s28 = scalar_lea.vmem %s1023_s4, %s646_s14 }
  0x36   : > { %vm317_vm0 = vcmask 7168   ;;  %v838_v4 = vmov -inf   ;;  %v839_v5 = vmov 0.0  }
  0x37   : > { %318 = vst.msk [vmem:[#allocation2] sm:$0xff] %vm317_vm0, %v838_v4  ;;  %319 = vst.msk [vmem:[#allocation2 + $0x8] sm:$0xff] %vm317_vm0, %v838_v4 }
  0x38   : > { %320 = vst.msk [vmem:[#allocation3] sm:$0xff] %vm317_vm0, %v839_v5  ;;  %321 = vst.msk [vmem:[#allocation3 + $0x8] sm:$0xff] %vm317_vm0, %v839_v5 }
  0x39 PF: > { %v751_v6 = vld [vmem:[%s261_s26 + $0x8] sm:$0xff]   ;;  %v840_v7 = vmov 0.0   ;;  %v752_v8 = vld [vmem:[%s261_s26] sm:$0xff]   ;;  %vm841_vm1 = vmmov 0   ;;  %vm352_vm2 = vcmask 261120   ;;  %v842_v17 = vmov 0  }
  0x3a   : > { %663 = vmatprep.subr.bf16.mxu0 %v840_v7  ;;  %667 = vmatprep.mubr.msk.bf16.mxu0 %vm841_vm1, %v840_v7  ;;  %v753_v9 = vld [vmem:[%s300_s17] sm:$0xff]   ;;  %vm439_vm3 = vcmask 7168   ;;  %p653_p3 = scmp.ne.s32.totalorder %s820_s19, 2 }
  0x3b   : > { %664 = vmatpush3.bf16.msra.mxu0 %v751_v6  ;;  %v648_v10 = vld [vmem:[%s304_s12] ss:$0 sm:$0xff]  ;;  %749 = vset.pattern.permute.xlu1 %v842_v17 }
  0x3c   : > { %665 = vmatprep.subr.bf16.mxu0 %v840_v7  ;;  %750 = vset.pattern.permute.xlu0 %v842_v17 }
  0x3e   : > { %v399_v18 = vld [vmem:[#allocation2] sm:$0xff]  ;;  %v400_v21 = vld [vmem:[#allocation2 + $0x8] sm:$0xff] }
  0x3f   : > { %666 = vmatpush3.bf16.msra.mxu0 %v752_v8  ;;  %v407_v37 = vld [vmem:[#allocation3] sm:$0xff]  ;;  %v408_v41 = vld [vmem:[#allocation3 + $0x8] sm:$0xff] }
  0x42   : > { %668 = vmatmul.mubr.msk.bf16.vlgmr.msra.gmra.mxu0 %vm352_vm2, %v753_v9 }
 0x102   : > { %v390_v11 = vpop.f32.mrf.mxu0 }
 0x103   : > { %v391_v12 = vadd.f32 %v648_v10, %v390_v11 }
 0x104   : > { %v669_v13 = vpop.f32.mrf.mxu0 }
 0x105   : > { %397 = vst [vmem:[%s969_s25] sm:$0xff] %v391_v12  ;;  %401 = vmax.xlane.f32.xlu0 %v391_v12 }
 0x106   : > { %v393_v14 = vpop.f32.mrf.mxu0 }
 0x107   : > { %v394_v15 = vadd.f32 %v648_v10, %v393_v14 }
 0x108   : > { %v670_v16 = vpop.f32.mrf.mxu0 }
 0x109   : > { %398 = vst [vmem:[%s969_s25 + $0x8] sm:$0xff] %v394_v15  ;;  %403 = vmax.xlane.f32.xlu0 %v394_v15 }
 0x18e   : > { %v402_v19 = vpop.xlane.xlu0 %401 }
 0x18f   : > { %v405_v20 = vmax.f32 %v399_v18, %v402_v19 }
 0x191   : > { %v409_v22 = vsub.f32 %v399_v18, %v405_v20  ;;  %442 = vst.msk [vmem:[#allocation2] sm:$0xff] %vm439_vm3, %v405_v20  ;;  %419 = vperm.xlu1 %749, %v405_v20  }
 0x192   : > { %v404_v23 = vpop.xlane.xlu0 %403 }
 0x193   : > { %v406_v24 = vmax.f32 %v400_v21, %v404_v23  ;;  %v411_v34 = vmul.f32 1.442695, %v409_v22 }
 0x195   : > { %v410_v25 = vsub.f32 %v400_v21, %v406_v24  ;;  %443 = vst.msk [vmem:[#allocation2 + $0x8] sm:$0xff] %vm439_vm3, %v406_v24  ;;  %424 = vperm.xlu1 %749, %v406_v24  }
 0x197   : > { %v413_v35 = vmul.f32 1.442695, %v410_v25 }
 0x20c   : > { %v420_v26 = vpop.permute.xlu1 %419 }
 0x20d   : > { %v427_v27 = vsub.f32 %v391_v12, %v420_v26 }
 0x20f   : > { %v429_v28 = vmul.f32 1.442695, %v427_v27 }
 0x210   : > { %v425_v29 = vpop.permute.xlu1 %424 }
 0x211   : > { %754 = vpow2.f32 %v429_v28  ;;  %v428_v30 = vsub.f32 %v394_v15, %v425_v29 }
 0x213   : > { %v431_v31 = vmul.f32 1.442695, %v428_v30 }
 0x215   : > { %756 = vpow2.f32 %v431_v31 }
 0x216   : > { %758 = vpow2.f32 %v411_v34 }
 0x217   : > { %760 = vpow2.f32 %v413_v35 }
 0x21e   : > { %v755_v32 = vpop.eup %754 }
 0x21f   : > { %433 = vadd.xlane.f32.xlu0 %v755_v32 }
 0x222   : > { %v757_v33 = vpop.eup %756 }
 0x223   : > { %435 = vadd.xlane.f32.xlu1 %v757_v33  ;;  %v759_v36 = vpop.eup %758 }
 0x224   : > { %v415_v38 = vmul.f32 %v759_v36, %v407_v37  ;;  %v761_v39 = vpop.eup %760 }
 0x225   : > { %v416_v43 = vmul.f32 %v761_v39, %v408_v41 }
 0x2a8   : > { %v434_v40 = vpop.xlane.xlu0 %433 }
 0x2a9   : > { %v437_v42 = vadd.f32 %v434_v40, %v415_v38 }
 0x2ab   : > { %440 = vst.msk [vmem:[#allocation3] sm:$0xff] %vm439_vm3, %v437_v42  ;;  %447 = sbr.rel (%p653_p3) target bundleno = 714 (0x2ca), region = 81 }
 0x2ac   : > { %v436_v44 = vpop.xlane.xlu1 %435 }
 0x2ad   : > { %v438_v45 = vadd.f32 %v436_v44, %v416_v43 }
 0x2af   : > { %441 = vst.msk [vmem:[#allocation3 + $0x8] sm:$0xff] %vm439_vm3, %v438_v45 }
 0x2b0   : > { %v448_v49 = vld [vmem:[#allocation2] sm:$0xff]  ;;  %v449_v52 = vld [vmem:[#allocation2 + $0x8] sm:$0xff] }
 0x2b2   : > { %v450_v46 = vld [vmem:[#allocation3] sm:$0xff] }
 0x2b3   : > { %762 = vlog2.f32 %v450_v46 }
 0x2b6   : > { %v451_v47 = vld [vmem:[#allocation3 + $0x8] sm:$0xff] }
 0x2b7   : > { %764 = vlog2.f32 %v451_v47 }
 0x2c0   : > { %v763_v48 = vpop.eup %762 }
 0x2c1   : > { %v453_v51 = vmul.f32 0.6931472, %v763_v48 }
 0x2c3   : > { %v456_v54 = vadd.f32 %v453_v51, %v448_v49 }
 0x2c4   : > { %v765_v50 = vpop.eup %764 }
 0x2c5   : > { %v455_v53 = vmul.f32 0.6931472, %v765_v50  ;;  %458 = vst.msk [vmem:[%s967_s28] sm:$0xff] %vm439_vm3, %v456_v54 }
 0x2c7   : > { %v457_v55 = vadd.f32 %v455_v53, %v449_v52 }
 0x2c9   : > { %459 = vst.msk [vmem:[%s967_s28 + $0x8] sm:$0xff] %vm439_vm3, %v457_v55 }
 0x2ca PF: > { %471 = sbr.rel (!%p935_p9) target bundleno = 721 (0x2d1), region = 85  ;;  %v507_v56 = vld [vmem:[%s969_s25] sm:$0xff] (%p935_p9)  ;;  %v509_v57 = vld [vmem:[%s969_s25 + $0x8] sm:$0xff] (%p935_p9) }
 0x2cb   : > { %s671_s1 = smul.u32 (%p935_p9), 6, %s824_s20 }
 0x2cd   : > { %s474_s26 = sadd.s32 (%p935_p9), %s820_s19, %s671_s1 }
 0x2ce   : > { %s657_s29 = sshll.u32 (%p935_p9), %s474_s26, 3 }
 0x2cf   : > { %s476_s9 = scalar_lea.vmem %s1022_s3, %s657_s29 }
 0x2d0   : > { %508 = vst [vmem:[%s476_s9] sm:$0xff] %v507_v56  ;;  %510 = vst [vmem:[%s476_s9 + $0x18] sm:$0xff] %v509_v57 }
 0x2d1 PF: > { %s15_s23 = sadd.s32 1, %s836_s23   ;;  %s1031_s7 = sld [smem:[#allocation6_spill]] }
 0x2d2   : > { %p12_p4 = scmp.ge.s32.totalorder %s15_s23, 8   ;;  %s1032_s25 = sld [smem:[#allocation7_spill]] }
 0x2d3   : > { %s1033_s15 = smov %s808_s16  ;;  %s1034_s16 = smov %s940_s8 }
 0x2d4   : > { %s1035_s17 = smov %s816_s18  ;;  %s1036_s18 = smov %s929_s30 }
 0x2d5   : > { %s1037_s19 = smov %s828_s21  ;;  %s1038_s20 = smov %s832_s22 }
 0x2d6   :  { %14 = sbr.rel (!%p12_p4) target bundleno = 7 (0x7), region = 172 }
 0x2d7   : > { %s1039_s21 = smov %s1031_s7 }
 0x2d8   : > { %s1040_s22 = smov %s1032_s25 }

</bundles_post_ra>
